<compile_context>
chip_gen: v7x
topology: tpu7x:2x2x1
jax: 0.10.0
libtpu: 0.0.40
codegen_flags: <defaults>
</compile_context>

<pallas_src>
import functools

import jax
import jax.numpy as jnp
from jax.experimental import pallas as pl
from jax.experimental.pallas import tpu as pltpu


# ------------------------------ math helpers ------------------------------ #

def _leaky_relu(x, negative_slope=0.01):
    return jnp.where(x > 0, x, negative_slope * x)


def _layernorm(x, gamma, beta, eps=1e-5):
    # One pass: mean and mean-of-squares are independent reductions; biased
    # variance + eps-inside-rsqrt matches torch.nn.LayerNorm.
    inv_d = 1.0 / x.shape[-1]
    mu = jnp.sum(x, axis=-1, keepdims=True) * inv_d
    ms = jnp.sum(x * x, axis=-1, keepdims=True) * inv_d
    var = ms - mu * mu
    return (x - mu) * jax.lax.rsqrt(var + eps) * gamma + beta


def _round_up(n, m):
    return ((n + m - 1) // m) * m


# ----------------------------- Pallas kernel ------------------------------ #

def actor_kernel(x_ref,            # (TB, stateDim)        f32
                 w1_ref, p1_ref,   # (stateDim, f1) cdt ; (3|1, f1) f32
                 w2_ref, p2_ref,   # (f1, f2)       cdt ; (3|1, f2) f32
                 w3_ref, b3_ref,   # (f2, n_pad)    cdt ; (1, n_pad) f32
                 o_ref,            # (TB, nActions) f32   (narrow, masked vst)
                 *, layer_norm: bool, n_actions: int):
    dt = w1_ref.dtype  # MXU compute dtype

    x = x_ref[...]

    # full1
    h = jnp.dot(x.astype(dt), w1_ref[...],
                preferred_element_type=jnp.float32) + p1_ref[0:1, :]
    if layer_norm:
        h = _layernorm(h, p1_ref[1:2, :], p1_ref[2:3, :])
    h = _leaky_relu(h)

    # full2
    h = jnp.dot(h.astype(dt), w2_ref[...],
                preferred_element_type=jnp.float32) + p2_ref[0:1, :]
    if layer_norm:
        h = _layernorm(h, p2_ref[1:2, :], p2_ref[2:3, :])
    h = _leaky_relu(h)

    # final (lane-padded weight for the MXU) -> slice to the true action
    # width -> tanh -> narrow masked store.
    out = jnp.dot(h.astype(dt), w3_ref[...],
                  preferred_element_type=jnp.float32) + b3_ref[...]
    o_ref[...] = jnp.tanh(out[:, :n_actions]).astype(o_ref.dtype)


# ---------------------------- parameter packing ---------------------------- #

def pack_actor_params(params, layer_norm, compute_dtype=jnp.bfloat16):
    """Pack raw params into kernel operands.  Call ONCE at parameter
    creation / update time (hoisted out of the per-forward path)."""
    (w1, b1, g1, be1, w2, b2, g2, be2, w3, b3) = params
    n_actions = w3.shape[1]
    n_pad = max(128, _round_up(n_actions, 128))

    # Lane-padded final layer: cheap, VMEM-resident, keeps the MXU operand
    # lane-dense; the OUTPUT stays narrow (nActions) so no extra HBM bytes.
    w3p = jnp.zeros((w3.shape[0], n_pad), jnp.float32).at[:, :n_actions].set(w3)
    b3p = jnp.zeros((1, n_pad), jnp.float32).at[:, :n_actions].set(b3)

    if layer_norm:
        p1 = jnp.concatenate([b1, g1, be1], axis=0)   # (3, f1)
        p2 = jnp.concatenate([b2, g2, be2], axis=0)   # (3, f2)
    else:
        p1, p2 = b1, b2                               # (1, f1), (1, f2)

    return (w1.astype(compute_dtype), p1,
            w2.astype(compute_dtype), p2,
            w3p.astype(compute_dtype), b3p)


# ------------------------------ tile selection ------------------------------ #

def _choose_tiles(batch, block_b):
    """num_tiles/TB/B_pad with <=7 padded rows per tile; force >=2 tiles when
    there is enough work so v7x's two TensorCores both get a batch shard."""
    num_tiles = pl.cdiv(batch, block_b)
    if batch >= 16:
        num_tiles = max(num_tiles, 2)
    tb = _round_up(pl.cdiv(batch, num_tiles), 8)
    b_pad = num_tiles * tb
    return num_tiles, tb, b_pad


# ------------------------------ Pallas wrapper ----------------------------- #

def actor_forward(x, packed, *, n_actions, layer_norm=True, block_b=512):
    """Pallas-backed Actor.forward.

    x:      (B, stateDim) float32
    packed: output of pack_actor_params (packed once, reused every call)
    block_b: keep >= 512 for throughput; tiny values only for correctness tests.
    """
    w1p, p1, w2p, p2, w3p, b3p = packed
    B, state_dim = x.shape

    num_tiles, TB, B_pad = _choose_tiles(B, block_b)
    if B_pad != B:
        x = jnp.pad(x, ((0, B_pad - B), (0, 0)))

    const = lambda i: (0, 0)  # weights: same VMEM block every grid step

    kernel = functools.partial(actor_kernel,
                               layer_norm=layer_norm, n_actions=n_actions)

    # NOTE: if full1Dim/full2Dim ever grow large (>=1024), add
    # pipeline_mode=pl.Buffered(1) to the constant-index weight specs to avoid
    # double-buffering blocks that never change (relevant to v7x's 64 MiB VMEM).
    out = pl.pallas_call(
        kernel,
        out_shape=jax.ShapeDtypeStruct((B_pad, n_actions), jnp.float32),
        grid=(num_tiles,),
        in_specs=[
            pl.BlockSpec((TB, state_dim), lambda i: (i, 0)),  # x (tiled)
            pl.BlockSpec(w1p.shape, const),
            pl.BlockSpec(p1.shape, const),
            pl.BlockSpec(w2p.shape, const),
            pl.BlockSpec(p2.shape, const),
            pl.BlockSpec(w3p.shape, const),
            pl.BlockSpec(b3p.shape, const),
        ],
        out_specs=pl.BlockSpec((TB, n_actions), lambda i: (i, 0)),
        compiler_params=pltpu.CompilerParams(
            dimension_semantics=("parallel",),
            vmem_limit_bytes=32 * 1024 * 1024,
        ),
    )(x, w1p, p1, w2p, p2, w3p, b3p)

    # Only pay a slice when the batch was actually padded.
    return out[:B] if B_pad != B else out


# --------------------------- parameter creation ---------------------------- #

def kaiming_uniform(key, fan_in, fan_out, a=0.01):
    # PyTorch kaiming_uniform_(a=0.01, fan_in, leaky_relu): bound = gain*sqrt(3/fan_in)
    gain = (2.0 / (1.0 + a * a)) ** 0.5
    bound = gain * (3.0 / fan_in) ** 0.5
    # stored pre-transposed as (fan_in, fan_out) for x @ W
    return jax.random.uniform(key, (fan_in, fan_out), jnp.float32, -bound, bound)


def linear_default_bias(key, fan_in, fan_out):
    bound = 1.0 / (fan_in ** 0.5)
    return jax.random.uniform(key, (1, fan_out), jnp.float32, -bound, bound)


def linear_default_weight(key, fan_in, fan_out):
    bound = 1.0 / (fan_in ** 0.5)
    return jax.random.uniform(key, (fan_in, fan_out), jnp.float32, -bound, bound)


def make_actor_params(key, state_dim, full1_dim, full2_dim, n_actions):
    ks = jax.random.split(key, 6)
    w1 = kaiming_uniform(ks[0], state_dim, full1_dim)
    b1 = linear_default_bias(ks[1], state_dim, full1_dim)
    g1 = jnp.ones((1, full1_dim), jnp.float32)
    be1 = jnp.zeros((1, full1_dim), jnp.float32)

    w2 = kaiming_uniform(ks[2], full1_dim, full2_dim)
    b2 = linear_default_bias(ks[3], full1_dim, full2_dim)
    g2 = jnp.ones((1, full2_dim), jnp.float32)
    be2 = jnp.zeros((1, full2_dim), jnp.float32)

    w3 = linear_default_weight(ks[4], full2_dim, n_actions)
    b3 = linear_default_bias(ks[5], full2_dim, n_actions)
    return (w1, b1, g1, be1, w2, b2, g2, be2, w3, b3)


# ------------------------------ reference ---------------------------------- #

def actor_forward_ref(x, params, *, layer_norm=True, compute_dtype=jnp.bfloat16):
    """Pure-JAX reference matching the kernel's dtype path (MXU in
    compute_dtype, f32 accumulation / elementwise)."""
    (w1, b1, g1, be1, w2, b2, g2, be2, w3, b3) = params
    h = jnp.dot(x.astype(compute_dtype), w1.astype(compute_dtype),
                preferred_element_type=jnp.float32) + b1
    if layer_norm:
        h = _layernorm(h, g1, be1)
    h = _leaky_relu(h)
    h = jnp.dot(h.astype(compute_dtype), w2.astype(compute_dtype),
                preferred_element_type=jnp.float32) + b2
    if layer_norm:
        h = _layernorm(h, g2, be2)
    h = _leaky_relu(h)
    out = jnp.dot(h.astype(compute_dtype), w3.astype(compute_dtype),
                  preferred_element_type=jnp.float32) + b3
    return jnp.tanh(out)


# --------------------------------- main ------------------------------------ #

if __name__ == "__main__":
    key = jax.random.PRNGKey(0)
    k_params, k_x = jax.random.split(key)

    batch = 8
    state_dim = 16
    full1_dim = 32
    full2_dim = 32
    n_actions = 4

    params = make_actor_params(k_params, state_dim, full1_dim, full2_dim, n_actions)
    x = jax.random.normal(k_x, (batch, state_dim), jnp.float32)

    # Pack ONCE (hoisted out of the per-call path).
    packed_ln = pack_actor_params(params, layer_norm=True)
    packed_nl = pack_actor_params(params, layer_norm=False)

    # layerNorm = True path
    out = jax.block_until_ready(
        actor_forward(x, packed_ln, n_actions=n_actions, layer_norm=True))
    ref = actor_forward_ref(x, params, layer_norm=True)
    assert out.shape == (batch, n_actions)
    assert jnp.allclose(out, ref, atol=1e-4, rtol=1e-4), "mismatch (layer_norm=True)"

    # layerNorm = False path (gamma/beta operands are dropped entirely)
    out_nl = jax.block_until_ready(
        actor_forward(x, packed_nl, n_actions=n_actions, layer_norm=False))
    ref_nl = actor_forward_ref(x, params, layer_norm=False)
    assert jnp.allclose(out_nl, ref_nl, atol=1e-4, rtol=1e-4), "mismatch (layer_norm=False)"

    # Multi-tile grid + ragged batch padding with the DEFAULT block_b
    # (B=20 >= 16 forces a 2-tile split so both v7x TensorCores get work).
    x2 = jax.random.normal(jax.random.PRNGKey(1), (20, state_dim), jnp.float32)
    out2 = jax.block_until_ready(
        actor_forward(x2, packed_ln, n_actions=n_actions, layer_norm=True))
    ref2 = actor_forward_ref(x2, params, layer_norm=True)
    assert out2.shape == (20, n_actions)
    assert jnp.allclose(out2, ref2, atol=1e-4, rtol=1e-4), "mismatch (2-tile grid)"

    # Tiny block_b only as a correctness stress of the 3-tile / padded path
    # (not a perf configuration).
    out3 = jax.block_until_ready(
        actor_forward(x2, packed_ln, n_actions=n_actions, layer_norm=True, block_b=8))
    assert jnp.allclose(out3, ref2, atol=1e-4, rtol=1e-4), "mismatch (3-tile grid)"

    print("KERNEL_OK")
</pallas_src>

<mosaic_0001>
module attributes {stable_mosaic.version = 11 : i64} {
  func.func @actor_kernel(%arg0: i32, %arg1: memref<8x16xf32, #tpu.memory_space<vmem>>, %arg2: memref<16x32xbf16, #tpu.memory_space<vmem>>, %arg3: memref<3x32xf32, #tpu.memory_space<vmem>>, %arg4: memref<32x32xbf16, #tpu.memory_space<vmem>>, %arg5: memref<3x32xf32, #tpu.memory_space<vmem>>, %arg6: memref<32x128xbf16, #tpu.memory_space<vmem>>, %arg7: memref<1x128xf32, #tpu.memory_space<vmem>>, %arg8: memref<8x4xf32, #tpu.memory_space<vmem>>) attributes {dimension_semantics = [#tpu.dimension_semantics<parallel>], iteration_bounds = array<i64: 1>, scalar_prefetch = 0 : i64, scratch_operands = 0 : i64, tpu.core_type = #tpu.core_type<tc>, window_params = [{transform_indices = @transform_0, window_bounds = array<i64: 8, 16>}, {pipeline_mode = #tpu.pipeline_mode<synchronous>, transform_indices = @transform_1, window_bounds = array<i64: 16, 32>}, {pipeline_mode = #tpu.pipeline_mode<synchronous>, transform_indices = @transform_2, window_bounds = array<i64: 3, 32>}, {pipeline_mode = #tpu.pipeline_mode<synchronous>, transform_indices = @transform_3, window_bounds = array<i64: 32, 32>}, {pipeline_mode = #tpu.pipeline_mode<synchronous>, transform_indices = @transform_4, window_bounds = array<i64: 3, 32>}, {pipeline_mode = #tpu.pipeline_mode<synchronous>, transform_indices = @transform_5, window_bounds = array<i64: 32, 128>}, {pipeline_mode = #tpu.pipeline_mode<synchronous>, transform_indices = @transform_6, window_bounds = array<i64: 1, 128>}, {transform_indices = @transform_7, window_bounds = array<i64: 8, 4>}]} {
    %c0 = arith.constant 0 : index
    %c0_0 = arith.constant 0 : index
    %0 = vector.load %arg1[%c0, %c0_0] : memref<8x16xf32, #tpu.memory_space<vmem>>, vector<8x16xf32>
    %1 = arith.truncf %0 : vector<8x16xf32> to vector<8x16xbf16>
    %c0_1 = arith.constant 0 : index
    %c0_2 = arith.constant 0 : index
    %2 = vector.load %arg2[%c0_1, %c0_2] : memref<16x32xbf16, #tpu.memory_space<vmem>>, vector<16x32xbf16>
    %cst = arith.constant dense<0.000000e+00> : vector<8x32xf32>
    %3 = tpu.matmul %1, %2, %cst {dimension_numbers = #tpu.dot_dimension_numbers<[1], [0], [0], [1], [0, 0, 1, 1], [], []>} : vector<8x16xbf16>, vector<16x32xbf16>, vector<8x32xf32> -> vector<8x32xf32>
    %c0_3 = arith.constant 0 : index
    %c0_4 = arith.constant 0 : index
    %4 = vector.load %arg3[%c0_3, %c0_4] : memref<3x32xf32, #tpu.memory_space<vmem>>, vector<1x32xf32>
    %5 = vector.broadcast %4 : vector<1x32xf32> to vector<8x32xf32>
    %6 = arith.addf %3, %5 : vector<8x32xf32>
    %c1 = arith.constant 1 : index
    %c0_5 = arith.constant 0 : index
    %7 = vector.load %arg3[%c1, %c0_5] : memref<3x32xf32, #tpu.memory_space<vmem>>, vector<1x32xf32>
    %c2 = arith.constant 2 : index
    %c0_6 = arith.constant 0 : index
    %8 = vector.load %arg3[%c2, %c0_6] : memref<3x32xf32, #tpu.memory_space<vmem>>, vector<1x32xf32>
    %cst_7 = arith.constant dense<0.000000e+00> : vector<8xf32>
    %9 = vector.multi_reduction <add>, %6, %cst_7 [1] : vector<8x32xf32> to vector<8xf32>
    %10 = vector.shape_cast %9 : vector<8xf32> to vector<8x1xf32>
    %cst_8 = arith.constant 3.125000e-02 : f32
    %11 = vector.broadcast %cst_8 : f32 to vector<8x1xf32>
    %12 = arith.mulf %10, %11 : vector<8x1xf32>
    %13 = arith.mulf %6, %6 : vector<8x32xf32>
    %cst_9 = arith.constant dense<0.000000e+00> : vector<8xf32>
    %14 = vector.multi_reduction <add>, %13, %cst_9 [1] : vector<8x32xf32> to vector<8xf32>
    %15 = vector.shape_cast %14 : vector<8xf32> to vector<8x1xf32>
    %cst_10 = arith.constant 3.125000e-02 : f32
    %16 = vector.broadcast %cst_10 : f32 to vector<8x1xf32>
    %17 = arith.mulf %15, %16 : vector<8x1xf32>
    %18 = arith.mulf %12, %12 : vector<8x1xf32>
    %19 = arith.subf %17, %18 : vector<8x1xf32>
    %20 = vector.broadcast %12 : vector<8x1xf32> to vector<8x32xf32>
    %21 = arith.subf %6, %20 : vector<8x32xf32>
    %cst_11 = arith.constant 9.99999974E-6 : f32
    %22 = vector.broadcast %cst_11 : f32 to vector<8x1xf32>
    %23 = arith.addf %19, %22 : vector<8x1xf32>
    %24 = math.rsqrt %23 : vector<8x1xf32>
    %25 = vector.broadcast %24 : vector<8x1xf32> to vector<8x32xf32>
    %26 = arith.mulf %21, %25 : vector<8x32xf32>
    %27 = vector.broadcast %7 : vector<1x32xf32> to vector<8x32xf32>
    %28 = arith.mulf %26, %27 : vector<8x32xf32>
    %29 = vector.broadcast %8 : vector<1x32xf32> to vector<8x32xf32>
    %30 = arith.addf %28, %29 : vector<8x32xf32>
    %cst_12 = arith.constant 0.000000e+00 : f32
    %31 = vector.broadcast %cst_12 : f32 to vector<8x32xf32>
    %32 = arith.cmpf ogt, %30, %31 : vector<8x32xf32>
    %cst_13 = arith.constant 0.00999999977 : f32
    %33 = vector.broadcast %cst_13 : f32 to vector<8x32xf32>
    %34 = arith.mulf %33, %30 : vector<8x32xf32>
    %35 = arith.select %32, %30, %34 : vector<8x32xi1>, vector<8x32xf32>
    %36 = arith.truncf %35 : vector<8x32xf32> to vector<8x32xbf16>
    %c0_14 = arith.constant 0 : index
    %c0_15 = arith.constant 0 : index
    %37 = vector.load %arg4[%c0_14, %c0_15] : memref<32x32xbf16, #tpu.memory_space<vmem>>, vector<32x32xbf16>
    %cst_16 = arith.constant dense<0.000000e+00> : vector<8x32xf32>
    %38 = tpu.matmul %36, %37, %cst_16 {dimension_numbers = #tpu.dot_dimension_numbers<[1], [0], [0], [1], [0, 0, 1, 1], [], []>} : vector<8x32xbf16>, vector<32x32xbf16>, vector<8x32xf32> -> vector<8x32xf32>
    %c0_17 = arith.constant 0 : index
    %c0_18 = arith.constant 0 : index
    %39 = vector.load %arg5[%c0_17, %c0_18] : memref<3x32xf32, #tpu.memory_space<vmem>>, vector<1x32xf32>
    %40 = vector.broadcast %39 : vector<1x32xf32> to vector<8x32xf32>
    %41 = arith.addf %38, %40 : vector<8x32xf32>
    %c1_19 = arith.constant 1 : index
    %c0_20 = arith.constant 0 : index
    %42 = vector.load %arg5[%c1_19, %c0_20] : memref<3x32xf32, #tpu.memory_space<vmem>>, vector<1x32xf32>
    %c2_21 = arith.constant 2 : index
    %c0_22 = arith.constant 0 : index
    %43 = vector.load %arg5[%c2_21, %c0_22] : memref<3x32xf32, #tpu.memory_space<vmem>>, vector<1x32xf32>
    %cst_23 = arith.constant dense<0.000000e+00> : vector<8xf32>
    %44 = vector.multi_reduction <add>, %41, %cst_23 [1] : vector<8x32xf32> to vector<8xf32>
    %45 = vector.shape_cast %44 : vector<8xf32> to vector<8x1xf32>
    %cst_24 = arith.constant 3.125000e-02 : f32
    %46 = vector.broadcast %cst_24 : f32 to vector<8x1xf32>
    %47 = arith.mulf %45, %46 : vector<8x1xf32>
    %48 = arith.mulf %41, %41 : vector<8x32xf32>
    %cst_25 = arith.constant dense<0.000000e+00> : vector<8xf32>
    %49 = vector.multi_reduction <add>, %48, %cst_25 [1] : vector<8x32xf32> to vector<8xf32>
    %50 = vector.shape_cast %49 : vector<8xf32> to vector<8x1xf32>
    %cst_26 = arith.constant 3.125000e-02 : f32
    %51 = vector.broadcast %cst_26 : f32 to vector<8x1xf32>
    %52 = arith.mulf %50, %51 : vector<8x1xf32>
    %53 = arith.mulf %47, %47 : vector<8x1xf32>
    %54 = arith.subf %52, %53 : vector<8x1xf32>
    %55 = vector.broadcast %47 : vector<8x1xf32> to vector<8x32xf32>
    %56 = arith.subf %41, %55 : vector<8x32xf32>
    %cst_27 = arith.constant 9.99999974E-6 : f32
    %57 = vector.broadcast %cst_27 : f32 to vector<8x1xf32>
    %58 = arith.addf %54, %57 : vector<8x1xf32>
    %59 = math.rsqrt %58 : vector<8x1xf32>
    %60 = vector.broadcast %59 : vector<8x1xf32> to vector<8x32xf32>
    %61 = arith.mulf %56, %60 : vector<8x32xf32>
    %62 = vector.broadcast %42 : vector<1x32xf32> to vector<8x32xf32>
    %63 = arith.mulf %61, %62 : vector<8x32xf32>
    %64 = vector.broadcast %43 : vector<1x32xf32> to vector<8x32xf32>
    %65 = arith.addf %63, %64 : vector<8x32xf32>
    %cst_28 = arith.constant 0.000000e+00 : f32
    %66 = vector.broadcast %cst_28 : f32 to vector<8x32xf32>
    %67 = arith.cmpf ogt, %65, %66 : vector<8x32xf32>
    %cst_29 = arith.constant 0.00999999977 : f32
    %68 = vector.broadcast %cst_29 : f32 to vector<8x32xf32>
    %69 = arith.mulf %68, %65 : vector<8x32xf32>
    %70 = arith.select %67, %65, %69 : vector<8x32xi1>, vector<8x32xf32>
    %71 = arith.truncf %70 : vector<8x32xf32> to vector<8x32xbf16>
    %c0_30 = arith.constant 0 : index
    %c0_31 = arith.constant 0 : index
    %72 = vector.load %arg6[%c0_30, %c0_31] : memref<32x128xbf16, #tpu.memory_space<vmem>>, vector<32x128xbf16>
    %cst_32 = arith.constant dense<0.000000e+00> : vector<8x128xf32>
    %73 = tpu.matmul %71, %72, %cst_32 {dimension_numbers = #tpu.dot_dimension_numbers<[1], [0], [0], [1], [0, 0, 1, 1], [], []>} : vector<8x32xbf16>, vector<32x128xbf16>, vector<8x128xf32> -> vector<8x128xf32>
    %c0_33 = arith.constant 0 : index
    %c0_34 = arith.constant 0 : index
    %74 = vector.load %arg7[%c0_33, %c0_34] : memref<1x128xf32, #tpu.memory_space<vmem>>, vector<1x128xf32>
    %75 = vector.broadcast %74 : vector<1x128xf32> to vector<8x128xf32>
    %76 = arith.addf %73, %75 : vector<8x128xf32>
    %77 = vector.extract_strided_slice %76 {offsets = [0, 0], sizes = [8, 4], strides = [1, 1]} : vector<8x128xf32> to vector<8x4xf32>
    %78 = math.tanh %77 : vector<8x4xf32>
    %c0_35 = arith.constant 0 : index
    %c0_36 = arith.constant 0 : index
    %79 = vector.load %arg8[%c0_35, %c0_36] : memref<8x4xf32, #tpu.memory_space<vmem>>, vector<8x4xf32>
    tpu.vector_store %arg8[%c0_35, %c0_36], %78 {strides = array<i32>} : memref<8x4xf32, #tpu.memory_space<vmem>>, vector<8x4xf32>,
    return
  }
  func.func @transform_0(%arg0: i32) -> (i32, i32) {
    %c0_i32 = arith.constant 0 : i32
    %c0_i32_0 = arith.constant 0 : i32
    return %arg0, %c0_i32 : i32, i32
  }
  func.func @transform_1(%arg0: i32) -> (i32, i32) {
    %c0_i32 = arith.constant 0 : i32
    %c0_i32_0 = arith.constant 0 : i32
    %c0_i32_1 = arith.constant 0 : i32
    return %c0_i32, %c0_i32_0 : i32, i32
  }
  func.func @transform_2(%arg0: i32) -> (i32, i32) {
    %c0_i32 = arith.constant 0 : i32
    %c0_i32_0 = arith.constant 0 : i32
    %c0_i32_1 = arith.constant 0 : i32
    return %c0_i32, %c0_i32_0 : i32, i32
  }
  func.func @transform_3(%arg0: i32) -> (i32, i32) {
    %c0_i32 = arith.constant 0 : i32
    %c0_i32_0 = arith.constant 0 : i32
    %c0_i32_1 = arith.constant 0 : i32
    return %c0_i32, %c0_i32_0 : i32, i32
  }
  func.func @transform_4(%arg0: i32) -> (i32, i32) {
    %c0_i32 = arith.constant 0 : i32
    %c0_i32_0 = arith.constant 0 : i32
    %c0_i32_1 = arith.constant 0 : i32
    return %c0_i32, %c0_i32_0 : i32, i32
  }
  func.func @transform_5(%arg0: i32) -> (i32, i32) {
    %c0_i32 = arith.constant 0 : i32
    %c0_i32_0 = arith.constant 0 : i32
    %c0_i32_1 = arith.constant 0 : i32
    return %c0_i32, %c0_i32_0 : i32, i32
  }
  func.func @transform_6(%arg0: i32) -> (i32, i32) {
    %c0_i32 = arith.constant 0 : i32
    %c0_i32_0 = arith.constant 0 : i32
    %c0_i32_1 = arith.constant 0 : i32
    return %c0_i32, %c0_i32_0 : i32, i32
  }
  func.func @transform_7(%arg0: i32) -> (i32, i32) {
    %c0_i32 = arith.constant 0 : i32
    %c0_i32_0 = arith.constant 0 : i32
    return %arg0, %c0_i32 : i32, i32
  }
}

</mosaic_0001>

<bundles_post_ra>
// kernel: tpu_custom_call.1
= control target key start
LH: loop header
LB: loop body
LE: loop exit
PB: predicated region body
PF: predicated region fallthrough
CT: control target
= control target key end

     0   :  { %12 = vsyncpa [#allocation3], 0  ;;  %s667_s0 = inlined_call_operand.hbm [shape: f32[8,16], index: 0, kind: input, shape index: {}]   ;;  %s668_s1 = inlined_call_operand.hbm [shape: bf16[16,32], index: 1, kind: input, shape index: {}]   ;;  %s669_s2 = inlined_call_operand.hbm [shape: f32[3,32], index: 2, kind: input, shape index: {}]   ;;  %s670_s3 = inlined_call_operand.hbm [shape: bf16[32,32], index: 3, kind: input, shape index: {}]   ;;  %s671_s4 = inlined_call_operand.hbm [shape: f32[3,32], index: 4, kind: input, shape index: {}]   ;;  %s672_s5 = inlined_call_operand.vmem [shape: bf16[32,128], index: 5, kind: input, shape index: {}]   ;;  %s673_s6 = inlined_call_operand.vmem [shape: f32[1,128], index: 6, kind: input, shape index: {}]   ;;  %s674_s7 = inlined_call_operand.vmem [shape: f32[8,4], index: 7, kind: output, shape index: {}]  }
   0x1   :  { %13 = vsyncpa [#allocation5], 0 }
   0x2   :  { %14 = vsyncpa [#allocation8], 0  ;;  %s532_s24 = smov [#allocation4]   ;;  %s416_s28 = scalar_lea.hbm %s668_s1, 128 }
   0x3   :  { %s30_s25 = sshll.u32 %s532_s24, 4  ;;  %p417_p0 = scmp.ne.s32.totalorder %s668_s1, %s416_s28  ;;  %s31_s25 = int_to_ptr.vmem [resolvable:$true] %s30_s25 }
   0x4   :  { %p420_p1 = scmp.lt.u32.totalorder %s416_s28, %s668_s1 }
   0x6   :  { %p422_p2 = pnand %p420_p1, %p417_p0 }
   0x8   :  { %425 = shalt.err (!%p422_p2)
}
   0x9   :  { %s426_s10 = scalar_lea.vmem %s31_s25, 128  ;;  %p431_p4 = scmp.lt.s32.totalorder %s31_s25, %s31_s25 }
   0xa   :  { %p427_p3 = scmp.ne.s32.totalorder %s31_s25, %s426_s10  ;;  %p432_p5 = scmp.lt.s32.totalorder %s426_s10, %s426_s10 }
   0xc   :  { %p433_p6 = por %p432_p5, %p431_p4 }
   0xe   :  { %p434_p7 = pnand %p433_p6, %p427_p3 }
  0x10   :  { %437 = shalt.err (!%p434_p7)
}
  0x11   :  { %s533_s11 = smov 64   ;;  %s534_s12 = smov 4  }
  0x12   :  { %36 = dma.hbm_to_vmem [thread:$0]  %s668_s1, 128, %s31_s25, [#allocation5], %s533_s11, %s533_s11, %s534_s12  }
  0x13   :  { %s535_s15 = smov [#allocation7]   ;;  %s536_s17 = smov [#allocation2]  }
  0x14   :  { %s52_s16 = sshll.u32 %s535_s15, 4  ;;  %s21_s18 = sshll.u32 %s536_s17, 4  ;;  %s53_s16 = int_to_ptr.vmem [resolvable:$true] %s52_s16  ;;  %s22_s18 = int_to_ptr.vmem [resolvable:$true] %s21_s18 }
  0x15   :  { %s438_s21 = scalar_lea.hbm %s670_s3, 256 }
  0x16   :  { %p439_p8 = scmp.ne.s32.totalorder %s670_s3, %s438_s21  ;;  %p442_p9 = scmp.lt.u32.totalorder %s438_s21, %s670_s3 }
  0x18   :  { %p444_p10 = pnand %p442_p9, %p439_p8 }
  0x1a   :  { %447 = shalt.err (!%p444_p10)
}
  0x1b   :  { %s448_s1 = scalar_lea.vmem %s53_s16, 256  ;;  %p453_p12 = scmp.lt.s32.totalorder %s53_s16, %s53_s16 }
  0x1c   :  { %p449_p11 = scmp.ne.s32.totalorder %s53_s16, %s448_s1  ;;  %p454_p13 = scmp.lt.s32.totalorder %s448_s1, %s448_s1 }
  0x1e   :  { %p455_p0 = por %p454_p13, %p453_p12 }
  0x20   :  { %p456_p1 = pnand %p455_p0, %p449_p11 }
  0x22   :  { %459 = shalt.err (!%p456_p1)
}
  0x23   :  { %58 = dma.hbm_to_vmem [thread:$0]  %s670_s3, 256, %s53_s16, [#allocation8], %s533_s11, %s533_s11, %s534_s12  }
  0x24   :  { %s460_s30 = scalar_lea.hbm %s667_s0, 128 }
  0x25   :  { %p461_p2 = scmp.ne.s32.totalorder %s667_s0, %s460_s30  ;;  %p464_p3 = scmp.lt.u32.totalorder %s460_s30, %s667_s0 }
  0x27   :  { %p466_p4 = pnand %p464_p3, %p461_p2 }
  0x29   :  { %469 = shalt.err (!%p466_p4)
}
  0x2a   :  { %s470_s14 = scalar_lea.vmem %s22_s18, 128  ;;  %p475_p6 = scmp.lt.s32.totalorder %s22_s18, %s22_s18 }
  0x2b   :  { %p471_p5 = scmp.ne.s32.totalorder %s22_s18, %s470_s14  ;;  %p476_p7 = scmp.lt.s32.totalorder %s470_s14, %s470_s14 }
  0x2d   :  { %p477_p8 = por %p476_p7, %p475_p6 }
  0x2f   :  { %p478_p9 = pnand %p477_p8, %p471_p5 }
  0x31   :  { %481 = shalt.err (!%p478_p9)
}
  0x32   :  { %24 = dma.hbm_to_vmem [thread:$0]  %s667_s0, 128, %s22_s18, [#allocation3]  }
  0x33   :  { %s537_s12 = smov [#allocation6]   ;;  %s538_s16 = smov [#allocation9]  }
  0x34   :  { %s43_s15 = sshll.u32 %s537_s12, 4  ;;  %s65_s17 = sshll.u32 %s538_s16, 4  ;;  %s44_s15 = int_to_ptr.vmem [resolvable:$true] %s43_s15  ;;  %s66_s17 = int_to_ptr.vmem [resolvable:$true] %s65_s17 }
  0x35   :  { %s482_s21 = scalar_lea.hbm %s669_s2, 64 }
  0x36   :  { %p483_p10 = scmp.ne.s32.totalorder %s669_s2, %s482_s21  ;;  %p486_p11 = scmp.lt.u32.totalorder %s482_s21, %s669_s2 }
  0x38   :  { %p488_p12 = pnand %p486_p11, %p483_p10 }
  0x3a   :  { %491 = shalt.err (!%p488_p12)
}
  0x3b   :  { %s492_s0 = scalar_lea.vmem %s44_s15, 64  ;;  %p497_p0 = scmp.lt.s32.totalorder %s44_s15, %s44_s15 }
  0x3c   :  { %p493_p13 = scmp.ne.s32.totalorder %s44_s15, %s492_s0  ;;  %p498_p1 = scmp.lt.s32.totalorder %s492_s0, %s492_s0 }
  0x3e   :  { %p499_p2 = por %p498_p1, %p497_p0 }
  0x40   :  { %p500_p3 = pnand %p499_p2, %p493_p13 }
  0x42   :  { %503 = shalt.err (!%p500_p3)
}
  0x43   :  { %46 = dma.hbm_to_vmem [thread:$0]  %s669_s2, 64, %s44_s15, [#allocation5]  }
  0x44   :  { %s504_s28 = scalar_lea.hbm %s671_s4, 64 }
  0x45   :  { %p505_p4 = scmp.ne.s32.totalorder %s671_s4, %s504_s28  ;;  %p508_p5 = scmp.lt.u32.totalorder %s504_s28, %s671_s4 }
  0x47   :  { %p510_p6 = pnand %p508_p5, %p505_p4 }
  0x49   :  { %513 = shalt.err (!%p510_p6)
}
  0x4a   :  { %s514_s10 = scalar_lea.vmem %s66_s17, 64  ;;  %p519_p8 = scmp.lt.s32.totalorder %s66_s17, %s66_s17 }
  0x4b   :  { %p515_p7 = scmp.ne.s32.totalorder %s66_s17, %s514_s10  ;;  %p520_p9 = scmp.lt.s32.totalorder %s514_s10, %s514_s10 }
  0x4d   :  { %p521_p10 = por %p520_p9, %p519_p8 }
  0x4f   :  { %p522_p11 = pnand %p521_p10, %p515_p7 }
  0x51   :  { %525 = shalt.err (!%p522_p11)
}
  0x52   :  { %68 = dma.hbm_to_vmem [thread:$0]  %s671_s4, 64, %s66_s17, [#allocation8]  }
  0x53   :  { %526 = dma.done.wait [#allocation3], 128  }
  0x54   :  { %527 = vsyncadd [#allocation3], 4294967168 }
  0x55   :  { %528 = dma.done.wait [#allocation5], 192  }
  0x56   :  { %529 = vsyncadd [#allocation5], 4294967104 }
  0x57   :  { %530 = dma.done.wait [#allocation8], 320  }
  0x58   :  { %531 = vsyncadd [#allocation8], 4294966976  ;;  %v539_v0 = vmov 0.0   ;;  %vm540_vm0 = vmmov 0   ;;  %v405_v1 = vld [vmem:[#allocation4] sm:$0xff]   ;;  %v89_v2 = vld [vmem:[#allocation2] sm:$0xff] }
  0x59   :  { %374 = vmatprep.subr.bf16.mxu0 %v539_v0  ;;  %376 = vmatprep.mubr.msk.bf16.mxu0 %vm540_vm0, %v539_v0  ;;  %vm104_vm1 = vcmask 130048   ;;  %v90_v3 = vpack.c.bf16 %v89_v2, %v89_v2  ;;  %v351_v4 = vld [vmem:[#allocation6] ss:$0 sm:$0xff]  ;;  %vm150_vm2 = vcmask 261120   ;;  %v406_v13 = vld [vmem:[#allocation7] sm:$0xff]   ;;  %v407_v14 = vld [vmem:[#allocation7 + $0x8] sm:$0xff]  }
  0x5a   :  { %380 = vmatprep.subr.bf16.mxu1 %v539_v0  ;;  %384 = vmatprep.mubr.msk.bf16.mxu1 %vm540_vm0, %v539_v0  ;;  %v354_v24 = vld [vmem:[#allocation6 + $0x1] ss:$0 sm:$0xff]  ;;  %v355_v26 = vld [vmem:[#allocation6 + $0x2] ss:$0 sm:$0xff]  ;;  %v356_v32 = vld [vmem:[#allocation9] ss:$0 sm:$0xff] }
  0x5b   :  { %375 = vmatpush3.bf16.msra.mxu0 %v405_v1  ;;  %381 = vmatpush3.bf16.msra.mxu1 %v406_v13  ;;  %v408_v41 = vld [vmem:[%s672_s5] sm:$0xff]   ;;  %v409_v42 = vld [vmem:[%s672_s5 + $0x8] sm:$0xff]   ;;  %v360_v52 = vld [vmem:[#allocation9 + $0x1] ss:$0 sm:$0xff]  ;;  %vm342_vm5 = vcmask 31744  }
  0x5c   :  { %388 = vmatprep.subr.bf16.mxu0 %v539_v0  ;;  %382 = vmatprep.subr.bf16.mxu1 %v539_v0  ;;  %v361_v54 = vld [vmem:[#allocation9 + $0x2] ss:$0 sm:$0xff]  ;;  %v362_v60 = vld [vmem:[%s673_s6] ss:$0 sm:$0xff] }
  0x5e   :  { %377 = vmatmul.mubr.msk.bf16.vlgmr.msra.gmra.mrb[0].mxu0 %vm104_vm1, %v90_v3 }
  0x5f   :  { %392 = vmatprep.mubr.msk.bf16.mxu0 %vm540_vm0, %v539_v0  ;;  %383 = vmatpush3.bf16.msra.mxu1 %v407_v14 }
  0x60   :  { %389 = vmatpush3.bf16.msra.mxu0 %v408_v41 }
  0x61   :  { %390 = vmatprep.subr.bf16.mxu0 %v539_v0 }
  0x64   :  { %391 = vmatpush3.bf16.msra.mxu0 %v409_v42 }
 0x131   :  { %v142_v5 = vpop.f32.mrb[0].mxu0 }
 0x132   :  { %v143_v6 = vadd.f32 %v351_v4, %v142_v5  ;;  %v378_v7 = vpop.f32.mrb[1].mxu0 }
 0x133   :  { %v145_v8 = vpop.f32.mrb[2].mxu0 }
 0x134   :  { %v379_v9 = vpop.f32.mrb[3].mxu0  ;;  %v151_v10 = vsel %vm150_vm2, %v143_v6, 0.0  ;;  %v155_v11 = vmul.f32 %v143_v6, %v143_v6 }
 0x135   :  { %152 = vadd.xlane.f32.xlu0 %v151_v10 }
 0x136   :  { %v156_v12 = vsel %vm150_vm2, %v155_v11, 0.0 }
 0x139   :  { %157 = vadd.xlane.f32.xlu0 %v156_v12 }
 0x1c2   :  { %v153_v15 = vpop.xlane.xlu0 %152 }
 0x1c3   :  { %v154_v16 = vmul.f32 0.03125, %v153_v15 }
 0x1c5   :  { %v160_v18 = vmul.f32 %v154_v16, %v154_v16  ;;  %v162_v22 = vsub.f32 %v143_v6, %v154_v16 }
 0x1c6   :  { %v158_v17 = vpop.xlane.xlu0 %157 }
 0x1c7   :  { %v159_v19 = vmul.f32 0.03125, %v158_v17 }
 0x1c9   :  { %v161_v20 = vsub.f32 %v159_v19, %v160_v18 }
 0x1cb   :  { %v163_v21 = vadd.f32 1e-05, %v161_v20 }
 0x1cd   :  { %410 = vrsqrt.f32 %v163_v21 }
 0x1d7   :  { %v411_v23 = vpop.eup %410 }
 0x1d8   :  { %v165_v25 = vmul.f32 %v411_v23, %v162_v22 }
 0x1da   :  { %v170_v27 = vmul.f32 %v354_v24, %v165_v25 }
 0x1dc   :  { %v175_v28 = vadd.f32 %v355_v26, %v170_v27 }
 0x1de   :  { %vm176_vm3 = vcmp.gt.f32.partialorder %v175_v28, 0.0  ;;  %v177_v29 = vmul.f32 0.01, %v175_v28 }
 0x1e0   :  { %v178_v30 = vsel %vm176_vm3, %v175_v28, %v177_v29 }
 0x1e1   :  { %v179_v31 = vpack.c.bf16 %v178_v30, %v178_v30 }
 0x1e3   :  { %385 = vmatmul.mubr.msk.bf16.vlgmr.msra.gmra.mrb[0].mxu1 %vm150_vm2, %v179_v31 }
 0x2b6   :  { %v238_v33 = vpop.f32.mrb[0].mxu1 }
 0x2b7   :  { %v239_v34 = vadd.f32 %v356_v32, %v238_v33  ;;  %v386_v35 = vpop.f32.mrb[1].mxu1 }
 0x2b8   :  { %v241_v36 = vpop.f32.mrb[2].mxu1 }
 0x2b9   :  { %v387_v37 = vpop.f32.mrb[3].mxu1  ;;  %v246_v38 = vsel %vm150_vm2, %v239_v34, 0.0  ;;  %v250_v39 = vmul.f32 %v239_v34, %v239_v34 }
 0x2ba   :  { %247 = vadd.xlane.f32.xlu1 %v246_v38 }
 0x2bb   :  { %v251_v40 = vsel %vm150_vm2, %v250_v39, 0.0 }
 0x2be   :  { %252 = vadd.xlane.f32.xlu1 %v251_v40 }
 0x347   :  { %v248_v43 = vpop.xlane.xlu1 %247 }
 0x348   :  { %v249_v44 = vmul.f32 0.03125, %v248_v43 }
 0x34a   :  { %v255_v46 = vmul.f32 %v249_v44, %v249_v44  ;;  %v257_v50 = vsub.f32 %v239_v34, %v249_v44 }
 0x34b   :  { %v253_v45 = vpop.xlane.xlu1 %252 }
 0x34c   :  { %v254_v47 = vmul.f32 0.03125, %v253_v45 }
 0x34e   :  { %v256_v48 = vsub.f32 %v254_v47, %v255_v46 }
 0x350   :  { %v258_v49 = vadd.f32 1e-05, %v256_v48 }
 0x352   :  { %412 = vrsqrt.f32 %v258_v49 }
 0x35c   :  { %v413_v51 = vpop.eup %412 }
 0x35d   :  { %v260_v53 = vmul.f32 %v413_v51, %v257_v50 }
 0x35f   :  { %v265_v55 = vmul.f32 %v360_v52, %v260_v53 }
 0x361   :  { %v270_v56 = vadd.f32 %v361_v54, %v265_v55 }
 0x363   :  { %vm271_vm4 = vcmp.gt.f32.partialorder %v270_v56, 0.0  ;;  %v272_v57 = vmul.f32 0.01, %v270_v56 }
 0x365   :  { %v273_v58 = vsel %vm271_vm4, %v270_v56, %v272_v57 }
 0x366   :  { %v274_v59 = vpack.c.bf16 %v273_v58, %v273_v58 }
 0x368   :  { %393 = vmatmul.mubr.msk.bf16.vlgmr.msra.gmra.mrb[4].mxu0 %vm150_vm2, %v274_v59 }
 0x43b   :  { %v335_v61 = vpop.f32.mrb[4].mxu0 }
 0x43c   :  { %v336_v62 = vadd.f32 %v362_v60, %v335_v61  ;;  %v394_v63 = vpop.f32.mrb[5].mxu0 }
 0x43d   :  { %v338_v0 = vpop.f32.mrb[6].mxu0 }
 0x43e   :  { %414 = vtanh.f32 %v336_v62  ;;  %v395_v1 = vpop.f32.mrb[7].mxu0 }
 0x448   :  { %v415_v2 = vpop.eup %414 }
 0x449   :  { %343 = vst.msk [vmem:[%s674_s7] sm:$0xff] %vm342_vm5, %v415_v2 }
 0x44a   :  { %348 = vsyncpa [#allocation3], 1 }
 0x44b   :  { %349 = vsyncpa [#allocation5], 1 }
 0x44c   :  { %350 = vsyncpa [#allocation8], 1 }

</bundles_post_ra>
